<compile_context>
chip_gen: v7x
topology: tpu7x:2x2x1
jax: 0.10.0
libtpu: 0.0.40
codegen_flags: <defaults>
</compile_context>

<pallas_src>
import jax
import jax.numpy as jnp
from jax import lax
from jax.experimental import pallas as pl
from jax.experimental.pallas import tpu as pltpu

LANE = 128                           # vreg lane width (last dim of the slab)
TARGET_BLOCK_BYTES = 1 * 1024 * 1024  # ~1 MiB per input per grid step
NUM_SPLITS = 2                       # leading 'parallel' axis (2 TCs on v7x)


def _round_up(x, m):
    return ((x + m - 1) // m) * m


def _make_mse_kernel(steps_per_split, block_rows, num_rows, needs_mask):
    """Build the reduction kernel with static tiling constants baked in."""

    def kernel(p_ref, r_ref, o_ref, acc_ref):
        c = pl.program_id(0)          # split (parallel) index
        t = pl.program_id(1)          # reduction step within this split

        @pl.when(t == 0)
        def _init():
            acc_ref[...] = jnp.zeros_like(acc_ref)

        # Cast in-kernel (inputs stay narrow in HBM); elementwise diff + square.
        d = r_ref[...].astype(jnp.float32) - p_ref[...].astype(jnp.float32)

        if needs_mask:
            # Nominal global block index (NOT the clamped one used for the DMA):
            # rows at/after num_rows are padding/duplicates -> zero them out.
            g = c * steps_per_split + t
            row = g * block_rows + lax.broadcasted_iota(jnp.int32, d.shape, 0)
            d = jnp.where(row < num_rows, d, 0.0)

        # Per-lane partial sums: pure VPU adds into the (1, LANE) accumulator.
        acc_ref[...] += jnp.sum(d * d, axis=0, keepdims=True)

        @pl.when(t == pl.num_programs(1) - 1)
        def _finalize():
            o_ref[...] = jnp.sum(acc_ref[...]).reshape(1, 1)

    return kernel


def mse(pred, real):
    """Pallas MSE: sum((real - pred)^2) / numel, matching torch semantics."""
    assert pred.shape == real.shape, "pred/real must have identical shapes"
    n = pred.size

    flat_p = pred.reshape(-1)   # zero-cost reshape, native dtype
    flat_r = real.reshape(-1)

    num_rows = n // LANE        # full lane-dense rows handled by the kernel
    n_main = num_rows * LANE

    # Ragged lane tail (< 128 elements): sum in plain JAX (negligible HBM traffic).
    if n_main < n:
        td = flat_r[n_main:].astype(jnp.float32) - flat_p[n_main:].astype(jnp.float32)
        tail_sum = jnp.sum(td * td)
    else:
        tail_sum = jnp.float32(0.0)

    if num_rows == 0:
        return tail_sum / jnp.float32(n)

    if n_main == n:
        # Common case: pure reshape, no data movement.
        p2 = flat_p.reshape(num_rows, LANE)
        r2 = flat_r.reshape(num_rows, LANE)
    else:
        # Rare ragged case: one prefix-slice copy per input (still far cheaper
        # than the old pad+upcast of both full arrays).
        p2 = flat_p[:n_main].reshape(num_rows, LANE)
        r2 = flat_r[:n_main].reshape(num_rows, LANE)

    # Block sizing: ~TARGET_BLOCK_BYTES per input per step.
    itemsize = jnp.dtype(pred.dtype).itemsize
    block_rows_cap = max(8, TARGET_BLOCK_BYTES // (LANE * itemsize))  # multiple of 8
    if num_rows <= block_rows_cap:
        block_rows = num_rows          # single block == full array dim (always legal)
    else:
        block_rows = block_rows_cap

    steps_total = pl.cdiv(num_rows, block_rows)
    splits = NUM_SPLITS if steps_total >= NUM_SPLITS else 1
    steps_per_split = pl.cdiv(steps_total, splits)

    covered_rows = splits * steps_per_split * block_rows
    needs_mask = covered_rows != num_rows
    needs_clamp = splits * steps_per_split > steps_total
    last_block = steps_total - 1

    if needs_clamp:
        # Clamp so the DMA never targets a fully out-of-bounds block; the
        # duplicated data is zeroed by the in-kernel mask.
        def in_map(c, t):
            return (jnp.minimum(c * steps_per_split + t, last_block), 0)
    else:
        def in_map(c, t):
            return (c * steps_per_split + t, 0)

    kernel = _make_mse_kernel(steps_per_split, block_rows, num_rows, needs_mask)

    partials = pl.pallas_call(
        kernel,
        out_shape=jax.ShapeDtypeStruct((splits, 1), jnp.float32),
        grid=(splits, steps_per_split),
        in_specs=[
            pl.BlockSpec((block_rows, LANE), in_map),
            pl.BlockSpec((block_rows, LANE), in_map),
        ],
        out_specs=pl.BlockSpec((1, 1), lambda c, t: (c, 0)),
        scratch_shapes=[pltpu.VMEM((1, LANE), jnp.float32)],
        compiler_params=pltpu.CompilerParams(
            dimension_semantics=("parallel", "arbitrary"),
            vmem_limit_bytes=32 * 1024 * 1024,
        ),
    )(p2, r2)

    return (jnp.sum(partials) + tail_sum) / jnp.float32(n)


def _reference_mse(pred, real):
    d = real.astype(jnp.float32) - pred.astype(jnp.float32)
    return jnp.sum(d * d) / pred.size


if __name__ == "__main__":
    key = jax.random.PRNGKey(0)

    test_shapes = [
        (2, 4, 16, 16),     # NCHW demo shape (single block, zero-copy path)
        (2, 3, 384, 200),   # multi-step path: 2-way split + masked partial block
        (7, 13),            # tiny ragged input (< 128 elems, pure JAX tail path)
    ]

    for shape in test_shapes:
        key, k_pred, k_real = jax.random.split(key, 3)
        pred = jax.random.normal(k_pred, shape, dtype=jnp.float32)
        real = jax.random.normal(k_real, shape, dtype=jnp.float32)

        result = jax.block_until_ready(mse(pred, real))
        ref = _reference_mse(pred, real)
        assert jnp.allclose(result, ref, rtol=1e-5, atol=1e-5), (shape, result, ref)

    print("KERNEL_OK")
</pallas_src>

<mosaic_0001>
module attributes {stable_mosaic.version = 11 : i64} {
  func.func @kernel(%arg0: i32, %arg1: i32, %arg2: memref<16x128xf32, #tpu.memory_space<vmem>>, %arg3: memref<16x128xf32, #tpu.memory_space<vmem>>, %arg4: memref<1x1xf32, #tpu.memory_space<vmem>>, %arg5: memref<1x128xf32, #tpu.memory_space<vmem>>) attributes {dimension_semantics = [#tpu.dimension_semantics<parallel>, #tpu.dimension_semantics<arbitrary>], iteration_bounds = array<i64: 1, 1>, scalar_prefetch = 0 : i64, scratch_operands = 1 : i64, tpu.core_type = #tpu.core_type<tc>, window_params = [{transform_indices = @transform_0, window_bounds = array<i64: 16, 128>}, {transform_indices = @transform_1, window_bounds = array<i64: 16, 128>}, {transform_indices = @transform_2, window_bounds = array<i64: 1, 1>}]} {
    %c0_i32 = arith.constant 0 : i32
    %0 = arith.cmpi eq, %arg1, %c0_i32 : i32
    %1 = arith.extui %0 : i1 to i32
    %c0_i32_0 = arith.constant 0 : i32
    %2 = arith.cmpi ne, %1, %c0_i32_0 : i32
    scf.if %2 {
      %cst_10 = arith.constant 0.000000e+00 : f32
      %15 = vector.broadcast %cst_10 : f32 to vector<1x128xf32>
      %c0_11 = arith.constant 0 : index
      %c0_12 = arith.constant 0 : index
      %16 = vector.load %arg5[%c0_11, %c0_12] : memref<1x128xf32, #tpu.memory_space<vmem>>, vector<1x128xf32>
      tpu.vector_store %arg5[%c0_11, %c0_12], %15 {strides = array<i32>} : memref<1x128xf32, #tpu.memory_space<vmem>>, vector<1x128xf32>,
    } else {
    }
    %c0 = arith.constant 0 : index
    %c0_1 = arith.constant 0 : index
    %3 = vector.load %arg3[%c0, %c0_1] : memref<16x128xf32, #tpu.memory_space<vmem>>, vector<16x128xf32>
    %c0_2 = arith.constant 0 : index
    %c0_3 = arith.constant 0 : index
    %4 = vector.load %arg2[%c0_2, %c0_3] : memref<16x128xf32, #tpu.memory_space<vmem>>, vector<16x128xf32>
    %5 = arith.subf %3, %4 : vector<16x128xf32>
    %c0_4 = arith.constant 0 : index
    %c0_5 = arith.constant 0 : index
    %6 = vector.load %arg5[%c0_4, %c0_5] : memref<1x128xf32, #tpu.memory_space<vmem>>, vector<1x128xf32>
    %7 = arith.mulf %5, %5 : vector<16x128xf32>
    %cst = arith.constant dense<0.000000e+00> : vector<128xf32>
    %8 = vector.multi_reduction <add>, %7, %cst [0] : vector<16x128xf32> to vector<128xf32>
    %9 = vector.shape_cast %8 : vector<128xf32> to vector<1x128xf32>
    %10 = arith.addf %6, %9 : vector<1x128xf32>
    %c0_6 = arith.constant 0 : index
    %c0_7 = arith.constant 0 : index
    %11 = vector.load %arg5[%c0_6, %c0_7] : memref<1x128xf32, #tpu.memory_space<vmem>>, vector<1x128xf32>
    tpu.vector_store %arg5[%c0_6, %c0_7], %10 {strides = array<i32>} : memref<1x128xf32, #tpu.memory_space<vmem>>, vector<1x128xf32>,
    %c0_i32_8 = arith.constant 0 : i32
    %12 = arith.cmpi eq, %arg1, %c0_i32_8 : i32
    %13 = arith.extui %12 : i1 to i32
    %c0_i32_9 = arith.constant 0 : i32
    %14 = arith.cmpi ne, %13, %c0_i32_9 : i32
    scf.if %14 {
      %c0_10 = arith.constant 0 : index
      %c0_11 = arith.constant 0 : index
      %15 = vector.load %arg5[%c0_10, %c0_11] : memref<1x128xf32, #tpu.memory_space<vmem>>, vector<1x128xf32>
      %16 = vector.shape_cast %15 : vector<1x128xf32> to vector<1x1x128xf32>
      %cst_12 = arith.constant dense<0.000000e+00> : vector<1xf32>
      %17 = vector.multi_reduction <add>, %16, %cst_12 [1, 2] : vector<1x1x128xf32> to vector<1xf32>
      %18 = vector.shape_cast %17 : vector<1xf32> to vector<1x1x1xf32>
      %19 = vector.extract %18[0, 0, 0] : f32 from vector<1x1x1xf32>
      %20 = vector.broadcast %19 : f32 to vector<1x1xf32>
      %c0_13 = arith.constant 0 : index
      %c0_14 = arith.constant 0 : index
      %21 = vector.load %arg4[%c0_13, %c0_14] : memref<1x1xf32, #tpu.memory_space<vmem>>, vector<1x1xf32>
      tpu.vector_store %arg4[%c0_13, %c0_14], %20 {strides = array<i32>} : memref<1x1xf32, #tpu.memory_space<vmem>>, vector<1x1xf32>,
    } else {
    }
    return
  }
  func.func @transform_0(%arg0: i32, %arg1: i32) -> (i32, i32) {
    %c1_i32 = arith.constant 1 : i32
    %0 = arith.muli %arg0, %c1_i32 : i32
    %1 = arith.addi %0, %arg1 : i32
    %c0_i32 = arith.constant 0 : i32
    %c0_i32_0 = arith.constant 0 : i32
    return %1, %c0_i32 : i32, i32
  }
  func.func @transform_1(%arg0: i32, %arg1: i32) -> (i32, i32) {
    %c1_i32 = arith.constant 1 : i32
    %0 = arith.muli %arg0, %c1_i32 : i32
    %1 = arith.addi %0, %arg1 : i32
    %c0_i32 = arith.constant 0 : i32
    %c0_i32_0 = arith.constant 0 : i32
    return %1, %c0_i32 : i32, i32
  }
  func.func @transform_2(%arg0: i32, %arg1: i32) -> (i32, i32) {
    %c0_i32 = arith.constant 0 : i32
    %c0_i32_0 = arith.constant 0 : i32
    return %arg0, %c0_i32 : i32, i32
  }
}

</mosaic_0001>

<bundles_post_ra>
// kernel: tpu_custom_call.1
= control target key start
LH: loop header
LB: loop body
LE: loop exit
PB: predicated region body
PF: predicated region fallthrough
CT: control target
= control target key end

     0   :  { %7 = vsyncpa [#allocation4], 0  ;;  %s246_s0 = inlined_call_operand.hbm [shape: f32[16,128], index: 0, kind: input, shape index: {}]   ;;  %s247_s1 = inlined_call_operand.hbm [shape: f32[16,128], index: 1, kind: input, shape index: {}]   ;;  %s248_s2 = inlined_call_operand.hbm [shape: f32[1,1], index: 2, kind: output, shape index: {}]  }
   0x1   :  { %8 = vsyncpa [#allocation7], 0 }
   0x2   :  { %9 = vsyncpa [#allocation5], 0  ;;  %s189_s9 = smov [#allocation3]   ;;  %s117_s13 = scalar_lea.hbm %s246_s0, 256 }
   0x3   :  { %s19_s10 = sshll.u32 %s189_s9, 4  ;;  %p118_p0 = scmp.ne.s32.totalorder %s246_s0, %s117_s13  ;;  %s20_s10 = int_to_ptr.vmem [resolvable:$true] %s19_s10 }
   0x4   :  { %p121_p1 = scmp.lt.u32.totalorder %s117_s13, %s246_s0 }
   0x6   :  { %p123_p2 = pnand %p121_p1, %p118_p0 }
   0x8   :  { %126 = shalt.err (!%p123_p2)
}
   0x9   :  { %s127_s18 = scalar_lea.vmem %s20_s10, 256  ;;  %p132_p4 = scmp.lt.s32.totalorder %s20_s10, %s20_s10 }
   0xa   :  { %p128_p3 = scmp.ne.s32.totalorder %s20_s10, %s127_s18  ;;  %p133_p5 = scmp.lt.s32.totalorder %s127_s18, %s127_s18 }
   0xc   :  { %p134_p6 = por %p133_p5, %p132_p4 }
   0xe   :  { %p135_p7 = pnand %p134_p6, %p128_p3 }
  0x10   :  { %138 = shalt.err (!%p135_p7)
}
  0x11   :  { %s190_s19 = smov 128   ;;  %s191_s20 = smov 8  }
  0x12   :  { %25 = dma.hbm_to_vmem [thread:$0]  %s246_s0, 256, %s20_s10, [#allocation4], %s190_s19, %s190_s19, %s191_s20  }
  0x13   :  { %s192_s23 = smov [#allocation6]   ;;  %s139_s27 = scalar_lea.hbm %s247_s1, 256 }
  0x14   :  { %s35_s24 = sshll.u32 %s192_s23, 4  ;;  %p140_p8 = scmp.ne.s32.totalorder %s247_s1, %s139_s27  ;;  %s36_s24 = int_to_ptr.vmem [resolvable:$true] %s35_s24 }
  0x15   :  { %p143_p9 = scmp.lt.u32.totalorder %s139_s27, %s247_s1 }
  0x17   :  { %p145_p10 = pnand %p143_p9, %p140_p8 }
  0x19   :  { %148 = shalt.err (!%p145_p10)
}
  0x1a   :  { %s149_s4 = scalar_lea.vmem %s36_s24, 256  ;;  %p154_p12 = scmp.lt.s32.totalorder %s36_s24, %s36_s24 }
  0x1b   :  { %p150_p11 = scmp.ne.s32.totalorder %s36_s24, %s149_s4  ;;  %p155_p13 = scmp.lt.s32.totalorder %s149_s4, %s149_s4 }
  0x1d   :  { %p156_p0 = por %p155_p13, %p154_p12 }
  0x1f   :  { %p157_p1 = pnand %p156_p0, %p150_p11 }
  0x21   :  { %160 = shalt.err (!%p157_p1)
}
  0x22   :  { %41 = dma.hbm_to_vmem [thread:$0]  %s247_s1, 256, %s36_s24, [#allocation7], %s190_s19, %s190_s19, %s191_s20  }
  0x23   :  { %183 = dma.done.wait [#allocation4], 256  }
  0x24   :  { %184 = vsyncadd [#allocation4], 4294967040 }
  0x25   :  { %185 = dma.done.wait [#allocation7], 256  }
  0x26   :  { %186 = vsyncadd [#allocation7], 4294967040  ;;  %v193_v0 = vmov 0.0   ;;  %v57_v1 = vld [vmem:[#allocation6] sm:$0xff]  ;;  %v58_v2 = vld [vmem:[#allocation6 + $0x8] sm:$0xff]  ;;  %vm79_vm0 = vcmask 1040384  }
  0x27   :  { %56 = vst [vmem:[#allocation2] sm:$0x1] %v193_v0  ;;  %v59_v3 = vld [vmem:[#allocation3] sm:$0xff]  ;;  %v60_v4 = vld [vmem:[#allocation3 + $0x8] sm:$0xff]  ;;  %s194_s1 = smov [#allocation8]   ;;  %vm91_vm1 = vcmask 0  }
  0x28   :  { %v61_v5 = vsub.f32 %v57_v1, %v59_v3  ;;  %v62_v6 = vsub.f32 %v58_v2, %v60_v4  ;;  %s99_s6 = sshll.u32 %s194_s1, 4  ;;  %s100_s6 = int_to_ptr.vmem [resolvable:$true] %s99_s6 }
  0x29   :  { %s161_s8 = scalar_lea.vmem %s100_s6, 16  ;;  %s165_s9 = scalar_lea.vmem %s100_s6, 32 }
  0x2a   :  { %v64_v7 = vmul.f32 %v61_v5, %v61_v5  ;;  %v65_v8 = vmul.f32 %v62_v6, %v62_v6  ;;  %p162_p2 = scmp.ne.s32.totalorder %s100_s6, %s161_s8  ;;  %p166_p3 = scmp.lt.s32.totalorder %s100_s6, %s100_s6 }
  0x2b   :  { %p167_p4 = scmp.lt.s32.totalorder %s165_s9, %s161_s8 }
  0x2c   :  { %v66_v9 = vadd.f32 %v65_v8, %v64_v7 }
  0x2d   :  { %p168_p5 = por %p167_p4, %p166_p3 }
  0x2e   :  { %v67_v10 = vrot.slane %v66_v9, 4  ;;  %v63_v15 = vld [vmem:[#allocation2] sm:$0x1] }
  0x2f   :  { %p169_p6 = pnand %p168_p5, %p162_p2 }
  0x30   :  { %v68_v11 = vadd.f32 %v67_v10, %v66_v9 }
  0x32   :  { %v69_v12 = vrot.slane %v68_v11, 2 }
  0x34   :  { %v70_v13 = vadd.f32 %v69_v12, %v68_v11 }
  0x36   :  { %v71_v14 = vrot.slane %v70_v13, 1 }
  0x38   :  { %v72_v16 = vadd.f32 %v71_v14, %v70_v13 }
  0x3a   :  { %v73_v17 = vadd.f32 %v72_v16, %v63_v15 }
  0x3c   :  { %74 = vst [vmem:[#allocation2] sm:$0x1] %v73_v17 }
  0x43   :  { %v78_v18 = vld [vmem:[#allocation2] sm:$0x1] }
  0x44   :  { %v80_v19 = vsel %vm79_vm0, %v78_v18, 0.0 }
  0x45   :  { %81 = vadd.xlane.f32.xlu0 %v80_v19 }
  0xd2   :  { %v82_v20 = vpop.xlane.xlu0 %81 }
  0xd3   :  { %v83_v21 = vrot.slane %v82_v20, 4 }
  0xd5   :  { %v84_v22 = vadd.f32 %v83_v21, %v82_v20 }
  0xd7   :  { %v85_v23 = vrot.slane %v84_v22, 2 }
  0xd9   :  { %v86_v24 = vadd.f32 %v85_v23, %v84_v22 }
  0xdb   :  { %v87_v25 = vrot.slane %v86_v24, 1 }
  0xdd   :  { %v88_v26 = vadd.f32 %v87_v25, %v86_v24 }
  0xdf   :  { %109 = vpush %v88_v26 }
 0x110   :  { %s110_s7 = spop %109 }
 0x111   :  { %v90_v27 = vstv %s110_s7 }
 0x112   :  { %92 = vst.msk [vmem:[#allocation8] sm:$0x1] %vm91_vm1, %v90_v27 }
 0x113   :  { %172 = shalt.err (!%p169_p6)
}
 0x114   :  { %s173_s12 = scalar_lea.hbm %s248_s2, 16 }
 0x115   :  { %p174_p7 = scmp.ne.s32.totalorder %s248_s2, %s173_s12  ;;  %p177_p8 = scmp.lt.u32.totalorder %s173_s12, %s248_s2 }
 0x117   :  { %p179_p9 = pnand %p177_p8, %p174_p7 }
 0x119   :  { %182 = shalt.err (!%p179_p9)
}
 0x11a   :  { %102 = dma.vmem_to_hbm [thread:$0]  %s100_s6, 16, %s248_s2, [#allocation5]  }
 0x11b   :  { %187 = dma.done.wait [#allocation5], 16  }
 0x11c   :  { %188 = vsyncadd [#allocation5], 4294967280 }
 0x11d   :  { %106 = vsyncpa [#allocation4], 1 }
 0x11e   :  { %107 = vsyncpa [#allocation7], 1 }
 0x11f   :  { %108 = vsyncpa [#allocation5], 1 }

</bundles_post_ra>
